<compile_context>
chip_gen: v7x
topology: tpu7x:2x2x1
jax: 0.10.0
libtpu: 0.0.40
codegen_flags: <defaults>
</compile_context>

<pallas_src>
import functools
import math

import jax
import jax.numpy as jnp
from jax.experimental import pallas as pl
from jax.experimental.pallas import tpu as pltpu


def _round_up(n, m):
    return ((n + m - 1) // m) * m


def _device_params():
    """Per-TPU-generation (vmem_budget, vmem_limit_bytes, target_step_bytes)."""
    kind = ""
    try:
        kind = jax.devices()[0].device_kind.lower()
    except Exception:
        pass
    if "v7" in kind:
        # 64 MiB physical VMEM per TC, ~3.2 TB/s HBM -> big steps, tight VMEM.
        return 36 << 20, 48 << 20, 10 << 20
    if "v5" in kind:
        # 128 MiB physical, ~0.8 TB/s HBM -> modest steps already hit roofline.
        return 48 << 20, 64 << 20, 2 << 20
    # v6e / default: 128 MiB physical, ~1.4 TB/s HBM.
    return 48 << 20, 64 << 20, 4 << 20


def _pick_tile_rows(n_rows, D, itemsize, vmem_budget, target_step_bytes):
    """Row-tile size: fit the VMEM budget, hit the per-step DMA target."""
    Dp = max(128, _round_up(D, 128))            # physical lane-padded width
    # 2x-double-buffered input + output tiles, plus ~2 f32 intermediate tiles.
    per_row_bytes = Dp * (4 * itemsize + 8)
    tm_cap = max(8, vmem_budget // per_row_bytes)
    tm_tgt = max(8, target_step_bytes // (2 * Dp * itemsize))
    tm = min(tm_cap, tm_tgt)
    tm = max(8, (tm // 8) * 8)
    # Never exceed the (sublane-rounded) problem size.
    tm = min(tm, _round_up(n_rows, 8))
    # For large problems keep >= ~8 grid steps so "parallel" can load-balance
    # row tiles across v7x's two TensorCores.
    if n_rows >= 4 * 256:
        tm = min(tm, max(256, _round_up(pl.cdiv(n_rows, 8), 8)))
    return max(8, (tm // 8) * 8)


def _layernorm_kernel(x_ref, gamma_ref, beta_ref, o_ref, *, eps, features,
                      approx_recip):
    # Current row-tile of tokens: (tm, D). Statistics in f32.
    xf = x_ref[...].astype(jnp.float32)

    mean = jnp.sum(xf, axis=-1, keepdims=True) * (1.0 / features)   # (tm, 1)
    diff = xf - mean

    # torch.std default: unbiased (divide by N-1); eps is added to std.
    denom = max(features - 1, 1)          # guard the degenerate features==1
    var = jnp.sum(diff * diff, axis=-1, keepdims=True) * (1.0 / denom)
    std = jnp.sqrt(var)
    if approx_recip:
        inv = pl.reciprocal(std + eps, approx=True)                  # EUP slot
    else:
        inv = 1.0 / (std + eps)

    o_ref[...] = (gamma_ref[...].astype(jnp.float32) * (diff * inv)
                  + beta_ref[...].astype(jnp.float32)).astype(o_ref.dtype)


def layer_norm(x, gamma, beta, *, eps=1e-6, approx_recip=True):
    """LayerNorm over the last axis. x: (..., D); gamma/beta: (D,)."""
    *lead, D = x.shape
    n_rows = math.prod(lead) if lead else 1
    x2 = x.reshape(n_rows, D)
    gamma2 = gamma.reshape(1, D)
    beta2 = beta.reshape(1, D)

    itemsize = x.dtype.itemsize
    vmem_budget, vmem_limit, target_step = _device_params()
    tm = _pick_tile_rows(n_rows, D, itemsize, vmem_budget, target_step)
    grid = (pl.cdiv(n_rows, tm),)

    kernel = functools.partial(_layernorm_kernel, eps=eps, features=D,
                               approx_recip=approx_recip)

    cost = pl.CostEstimate(
        flops=8 * n_rows * D,
        transcendentals=2 * n_rows,
        bytes_accessed=(2 * n_rows * D + 2 * D) * itemsize)

    out = pl.pallas_call(
        kernel,
        out_shape=jax.ShapeDtypeStruct((n_rows, D), x.dtype),
        grid_spec=pltpu.PrefetchScalarGridSpec(
            num_scalar_prefetch=0,
            grid=grid,
            in_specs=[
                # Last block dim == full array dim D, so D need not be a
                # multiple of 128; the compiler masks partial lanes itself.
                pl.BlockSpec((tm, D), lambda i: (i, 0)),   # x row-tile
                pl.BlockSpec((1, D), lambda i: (0, 0)),    # gamma (a_2)
                pl.BlockSpec((1, D), lambda i: (0, 0)),    # beta  (b_2)
            ],
            out_specs=pl.BlockSpec((tm, D), lambda i: (i, 0)),
        ),
        compiler_params=pltpu.CompilerParams(
            dimension_semantics=("parallel",),    # shard row tiles across TCs
            vmem_limit_bytes=vmem_limit),
        cost_estimate=cost,
    )(x2, gamma2, beta2)

    return out.reshape(x.shape)


def reference(x, gamma, beta, eps=1e-6):
    """Pure-JAX reference mirroring the PyTorch forward."""
    xf = x.astype(jnp.float32)
    mean = jnp.mean(xf, axis=-1, keepdims=True)
    std = jnp.sqrt(jnp.sum((xf - mean) ** 2, axis=-1, keepdims=True)
                   / max(x.shape[-1] - 1, 1))
    return (gamma * (xf - mean) / (std + eps) + beta).astype(x.dtype)


if __name__ == "__main__":
    key = jax.random.PRNGKey(0)
    k1, k2, k3, k4, k5 = jax.random.split(key, 5)

    # Small transformer-ish shapes: (batch, seq, hidden).
    B, S, D = 2, 8, 32
    x = jax.random.normal(k1, (B, S, D), dtype=jnp.float32)
    gamma = 1.0 + 0.1 * jax.random.normal(k2, (D,), dtype=jnp.float32)
    beta = 0.1 * jax.random.normal(k3, (D,), dtype=jnp.float32)

    out = jax.block_until_ready(layer_norm(x, gamma, beta))
    ref = reference(x, gamma, beta)
    assert out.shape == x.shape
    assert jnp.allclose(out, ref, atol=5e-3, rtol=5e-3), (
        f"max abs err = {jnp.max(jnp.abs(out - ref))}")

    # Lane-dense hidden dim (multiple of 128) + multiple row tiles.
    B2, S2, D2 = 4, 128, 128
    x2 = jax.random.normal(k4, (B2, S2, D2), dtype=jnp.float32)
    g2 = jnp.ones((D2,), dtype=jnp.float32)
    b2 = jnp.zeros((D2,), dtype=jnp.float32)
    out2 = jax.block_until_ready(layer_norm(x2, g2, b2))
    ref2 = reference(x2, g2, b2)
    assert jnp.allclose(out2, ref2, atol=5e-3, rtol=5e-3), (
        f"max abs err = {jnp.max(jnp.abs(out2 - ref2))}")

    # Non-128-multiple hidden dim and a ragged row count (no wrapper padding).
    B3, S3, D3 = 3, 37, 80
    x3 = jax.random.normal(k5, (B3, S3, D3), dtype=jnp.float32)
    g3 = 1.0 + 0.05 * jnp.arange(D3, dtype=jnp.float32) / D3
    b3 = 0.01 * jnp.arange(D3, dtype=jnp.float32)
    out3 = jax.block_until_ready(layer_norm(x3, g3, b3))
    ref3 = reference(x3, g3, b3)
    assert jnp.allclose(out3, ref3, atol=5e-3, rtol=5e-3), (
        f"max abs err = {jnp.max(jnp.abs(out3 - ref3))}")

    print("KERNEL_OK")
</pallas_src>

<mosaic_0001>
module attributes {stable_mosaic.version = 11 : i64} {
  func.func @_layernorm_kernel(%arg0: i32, %arg1: memref<16x32xf32, #tpu.memory_space<vmem>>, %arg2: memref<1x32xf32, #tpu.memory_space<vmem>>, %arg3: memref<1x32xf32, #tpu.memory_space<vmem>>, %arg4: memref<16x32xf32, #tpu.memory_space<vmem>>) attributes {dimension_semantics = [#tpu.dimension_semantics<parallel>], iteration_bounds = array<i64: 1>, scalar_prefetch = 0 : i64, scratch_operands = 0 : i64, tpu.core_type = #tpu.core_type<tc>, window_params = [{transform_indices = @transform_0, window_bounds = array<i64: 16, 32>}, {pipeline_mode = #tpu.pipeline_mode<synchronous>, transform_indices = @transform_1, window_bounds = array<i64: 1, 32>}, {pipeline_mode = #tpu.pipeline_mode<synchronous>, transform_indices = @transform_2, window_bounds = array<i64: 1, 32>}, {transform_indices = @transform_3, window_bounds = array<i64: 16, 32>}]} {
    %c0 = arith.constant 0 : index
    %c0_0 = arith.constant 0 : index
    %0 = vector.load %arg1[%c0, %c0_0] : memref<16x32xf32, #tpu.memory_space<vmem>>, vector<16x32xf32>
    %cst = arith.constant dense<0.000000e+00> : vector<16xf32>
    %1 = vector.multi_reduction <add>, %0, %cst [1] : vector<16x32xf32> to vector<16xf32>
    %2 = vector.shape_cast %1 : vector<16xf32> to vector<16x1xf32>
    %cst_1 = arith.constant 3.125000e-02 : f32
    %3 = vector.broadcast %cst_1 : f32 to vector<16x1xf32>
    %4 = arith.mulf %2, %3 : vector<16x1xf32>
    %5 = vector.broadcast %4 : vector<16x1xf32> to vector<16x32xf32>
    %6 = arith.subf %0, %5 : vector<16x32xf32>
    %7 = arith.mulf %6, %6 : vector<16x32xf32>
    %cst_2 = arith.constant dense<0.000000e+00> : vector<16xf32>
    %8 = vector.multi_reduction <add>, %7, %cst_2 [1] : vector<16x32xf32> to vector<16xf32>
    %9 = vector.shape_cast %8 : vector<16xf32> to vector<16x1xf32>
    %cst_3 = arith.constant 0.0322580636 : f32
    %10 = vector.broadcast %cst_3 : f32 to vector<16x1xf32>
    %11 = arith.mulf %9, %10 : vector<16x1xf32>
    %12 = math.sqrt %11 : vector<16x1xf32>
    %cst_4 = arith.constant 9.99999997E-7 : f32
    %13 = vector.broadcast %cst_4 : f32 to vector<16x1xf32>
    %14 = arith.addf %12, %13 : vector<16x1xf32>
    %15 = tpu.reciprocal %14 {approx = true} : vector<16x1xf32> -> vector<16x1xf32>
    %c0_5 = arith.constant 0 : index
    %c0_6 = arith.constant 0 : index
    %16 = vector.load %arg2[%c0_5, %c0_6] : memref<1x32xf32, #tpu.memory_space<vmem>>, vector<1x32xf32>
    %17 = vector.broadcast %15 : vector<16x1xf32> to vector<16x32xf32>
    %18 = arith.mulf %6, %17 : vector<16x32xf32>
    %19 = vector.broadcast %16 : vector<1x32xf32> to vector<16x32xf32>
    %20 = arith.mulf %19, %18 : vector<16x32xf32>
    %c0_7 = arith.constant 0 : index
    %c0_8 = arith.constant 0 : index
    %21 = vector.load %arg3[%c0_7, %c0_8] : memref<1x32xf32, #tpu.memory_space<vmem>>, vector<1x32xf32>
    %22 = vector.broadcast %21 : vector<1x32xf32> to vector<16x32xf32>
    %23 = arith.addf %20, %22 : vector<16x32xf32>
    %c0_9 = arith.constant 0 : index
    %c0_10 = arith.constant 0 : index
    %24 = vector.load %arg4[%c0_9, %c0_10] : memref<16x32xf32, #tpu.memory_space<vmem>>, vector<16x32xf32>
    tpu.vector_store %arg4[%c0_9, %c0_10], %23 {strides = array<i32>} : memref<16x32xf32, #tpu.memory_space<vmem>>, vector<16x32xf32>,
    return
  }
  func.func @transform_0(%arg0: i32) -> (i32, i32) {
    %c0_i32 = arith.constant 0 : i32
    %c0_i32_0 = arith.constant 0 : i32
    return %arg0, %c0_i32 : i32, i32
  }
  func.func @transform_1(%arg0: i32) -> (i32, i32) {
    %c0_i32 = arith.constant 0 : i32
    %c0_i32_0 = arith.constant 0 : i32
    %c0_i32_1 = arith.constant 0 : i32
    return %c0_i32, %c0_i32_0 : i32, i32
  }
  func.func @transform_2(%arg0: i32) -> (i32, i32) {
    %c0_i32 = arith.constant 0 : i32
    %c0_i32_0 = arith.constant 0 : i32
    %c0_i32_1 = arith.constant 0 : i32
    return %c0_i32, %c0_i32_0 : i32, i32
  }
  func.func @transform_3(%arg0: i32) -> (i32, i32) {
    %c0_i32 = arith.constant 0 : i32
    %c0_i32_0 = arith.constant 0 : i32
    return %arg0, %c0_i32 : i32, i32
  }
}

</mosaic_0001>

<bundles_post_ra>
// kernel: tpu_custom_call.1
= control target key start
LH: loop header
LB: loop body
LE: loop exit
PB: predicated region body
PF: predicated region fallthrough
CT: control target
= control target key end

     0   :  { %8 = vsyncpa [#allocation3], 0  ;;  %s336_s0 = inlined_call_operand.hbm [shape: f32[16,32], index: 0, kind: input, shape index: {}]   ;;  %s337_s1 = inlined_call_operand.hbm [shape: f32[1,32], index: 1, kind: input, shape index: {}]   ;;  %s338_s2 = inlined_call_operand.hbm [shape: f32[1,32], index: 2, kind: input, shape index: {}]   ;;  %s339_s3 = inlined_call_operand.hbm [shape: f32[16,32], index: 3, kind: output, shape index: {}]  }
   0x1   :  { %9 = vsyncpa [#allocation6], 0 }
   0x2   :  { %10 = vsyncpa [#allocation4], 0  ;;  %s243_s12 = smov [#allocation5]   ;;  %s244_s14 = smov [#allocation2]  }
   0x3   :  { %s29_s13 = sshll.u32 %s243_s12, 4  ;;  %s16_s15 = sshll.u32 %s244_s14, 4  ;;  %s30_s13 = int_to_ptr.vmem [resolvable:$true] %s29_s13  ;;  %s269_s15 = int_to_ptr.vmem [resolvable:$true] %s16_s15 }
   0x4   :  { %s149_s18 = scalar_lea.hbm %s337_s1, 16 }
   0x5   :  { %p150_p0 = scmp.ne.s32.totalorder %s337_s1, %s149_s18  ;;  %p153_p1 = scmp.lt.u32.totalorder %s149_s18, %s337_s1 }
   0x7   :  { %p155_p2 = pnand %p153_p1, %p150_p0 }
   0x9   :  { %158 = shalt.err (!%p155_p2)
}
   0xa   :  { %s159_s23 = scalar_lea.vmem %s30_s13, 16  ;;  %s163_s24 = scalar_lea.vmem %s30_s13, 32 }
   0xb   :  { %p160_p3 = scmp.ne.s32.totalorder %s30_s13, %s159_s23  ;;  %p164_p4 = scmp.lt.s32.totalorder %s30_s13, %s30_s13 }
   0xc   :  { %p165_p5 = scmp.lt.s32.totalorder %s163_s24, %s159_s23 }
   0xe   :  { %p166_p6 = por %p165_p5, %p164_p4 }
  0x10   :  { %p167_p7 = pnand %p166_p6, %p160_p3 }
  0x12   :  { %170 = shalt.err (!%p167_p7)
}
  0x13   :  { %32 = dma.hbm_to_vmem [thread:$0]  %s337_s1, 16, %s30_s13, [#allocation6]  }
  0x14   :  { %s171_s29 = scalar_lea.hbm %s336_s0, 256 }
  0x15   :  { %p172_p8 = scmp.ne.s32.totalorder %s336_s0, %s171_s29  ;;  %p175_p9 = scmp.lt.u32.totalorder %s171_s29, %s336_s0 }
  0x17   :  { %p177_p10 = pnand %p175_p9, %p172_p8 }
  0x19   :  { %180 = shalt.err (!%p177_p10)
}
  0x1a   :  { %s181_s7 = scalar_lea.vmem %s269_s15, 256  ;;  %p186_p12 = scmp.lt.s32.totalorder %s269_s15, %s269_s15 }
  0x1b   :  { %p182_p11 = scmp.ne.s32.totalorder %s269_s15, %s181_s7  ;;  %p187_p13 = scmp.lt.s32.totalorder %s181_s7, %s181_s7 }
  0x1d   :  { %p188_p0 = por %p187_p13, %p186_p12 }
  0x1f   :  { %p189_p1 = pnand %p188_p0, %p182_p11 }
  0x21   :  { %192 = shalt.err (!%p189_p1)
}
  0x22   :  { %s245_s1 = smov 128   ;;  %s246_s8 = smov 8  }
  0x23   :  { %22 = dma.hbm_to_vmem [thread:$0]  %s336_s0, 256, %s269_s15, [#allocation3], %s245_s1, %s245_s1, %s246_s8  }
  0x24   :  { %s247_s11 = smov [#allocation7]   ;;  %s193_s16 = scalar_lea.hbm %s338_s2, 16 }
  0x25   :  { %s39_s12 = sshll.u32 %s247_s11, 4  ;;  %p194_p2 = scmp.ne.s32.totalorder %s338_s2, %s193_s16  ;;  %s40_s12 = int_to_ptr.vmem [resolvable:$true] %s39_s12 }
  0x26   :  { %p197_p3 = scmp.lt.u32.totalorder %s193_s16, %s338_s2 }
  0x28   :  { %p199_p4 = pnand %p197_p3, %p194_p2 }
  0x2a   :  { %202 = shalt.err (!%p199_p4)
}
  0x2b   :  { %s203_s21 = scalar_lea.vmem %s40_s12, 16  ;;  %s207_s0 = scalar_lea.vmem %s40_s12, 32 }
  0x2c   :  { %p204_p5 = scmp.ne.s32.totalorder %s40_s12, %s203_s21  ;;  %p208_p6 = scmp.lt.s32.totalorder %s40_s12, %s40_s12 }
  0x2d   :  { %p209_p7 = scmp.lt.s32.totalorder %s207_s0, %s203_s21 }
  0x2f   :  { %p210_p8 = por %p209_p7, %p208_p6 }
  0x31   :  { %p211_p9 = pnand %p210_p8, %p204_p5 }
  0x33   :  { %214 = shalt.err (!%p211_p9)
}
  0x34   :  { %42 = dma.hbm_to_vmem [thread:$0]  %s338_s2, 16, %s40_s12, [#allocation6]  }
  0x35   :  { %237 = dma.done.wait [#allocation3], 256  }
  0x36   :  { %238 = vsyncadd [#allocation3], 4294967040 }
  0x37   :  { %239 = dma.done.wait [#allocation6], 32  }
  0x38   :  { %240 = vsyncadd [#allocation6], 4294967264  ;;  %vm54_vm0 = vcmask 261120   ;;  %v52_v0 = vld [vmem:[#allocation2] sm:$0xff]  ;;  %v53_v1 = vld [vmem:[#allocation2 + $0x8] sm:$0xff]  ;;  %s248_s2 = smov [#allocation8]  }
  0x39   :  { %v55_v2 = vsel %vm54_vm0, %v52_v0, 0.0  ;;  %v58_v3 = vsel %vm54_vm0, %v53_v1, 0.0  ;;  %v133_v31 = vld [vmem:[#allocation5] ss:$0 sm:$0xff]  ;;  %v134_v33 = vld [vmem:[#allocation7] ss:$0 sm:$0xff] }
  0x3a   :  { %56 = vadd.xlane.f32.xlu0 %v55_v2  ;;  %s120_s23 = sshll.u32 %s248_s2, 4  ;;  %s121_s23 = int_to_ptr.vmem [resolvable:$true] %s120_s23 }
  0x3b   :  { %s215_s24 = scalar_lea.vmem %s121_s23, 256  ;;  %p220_p11 = scmp.lt.s32.totalorder %s121_s23, %s121_s23 }
  0x3c   :  { %p216_p10 = scmp.ne.s32.totalorder %s121_s23, %s215_s24  ;;  %p221_p12 = scmp.lt.s32.totalorder %s215_s24, %s215_s24 }
  0x3e   :  { %59 = vadd.xlane.f32.xlu0 %v58_v3  ;;  %p222_p13 = por %p221_p12, %p220_p11 }
  0x40   :  { %p223_p0 = pnand %p222_p13, %p216_p10 }
  0xc7   :  { %v57_v4 = vpop.xlane.xlu0 %56 }
  0xc8   :  { %v61_v5 = vmul.f32 0.03125, %v57_v4 }
  0xca   :  { %v63_v6 = vsub.f32 %v52_v0, %v61_v5 }
  0xcb   :  { %v60_v7 = vpop.xlane.xlu0 %59 }
  0xcc   :  { %v62_v8 = vmul.f32 0.03125, %v60_v7  ;;  %v65_v9 = vmul.f32 %v63_v6, %v63_v6 }
  0xce   :  { %v64_v10 = vsub.f32 %v53_v1, %v62_v8  ;;  %v67_v11 = vsel %vm54_vm0, %v65_v9, 0.0 }
  0xcf   :  { %68 = vadd.xlane.f32.xlu1 %v67_v11 }
  0xd0   :  { %v66_v12 = vmul.f32 %v64_v10, %v64_v10 }
  0xd2   :  { %v70_v13 = vsel %vm54_vm0, %v66_v12, 0.0 }
  0xd3   :  { %71 = vadd.xlane.f32.xlu1 %v70_v13 }
 0x15c   :  { %v69_v14 = vpop.xlane.xlu1 %68 }
 0x15d   :  { %v73_v15 = vmul.f32 0.032258064, %v69_v14 }
 0x15f   :  { %141 = vrsqrt.f32 %v73_v15  ;;  %vm77_vm1 = vcmp.eq.f32.partialorder %v73_v15, inf  ;;  %v80_v20 = vand.u32 2147483648, %v73_v15  ;;  %vm79_vm2 = vcmp.eq.f32.partialorder %v73_v15, 0.0 }
 0x160   :  { %v72_v16 = vpop.xlane.xlu1 %71 }
 0x161   :  { %v74_v17 = vmul.f32 0.032258064, %v72_v16 }
 0x163   :  { %143 = vrsqrt.f32 %v74_v17  ;;  %vm84_vm3 = vcmp.eq.f32.partialorder %v74_v17, inf  ;;  %v87_v26 = vand.u32 2147483648, %v74_v17  ;;  %vm86_vm4 = vcmp.eq.f32.partialorder %v74_v17, 0.0 }
 0x169   :  { %v142_v18 = vpop.eup %141 }
 0x16a   :  { %v76_v19 = vmul.f32 %v142_v18, %v73_v15 }
 0x16c   :  { %v78_v21 = vsel %vm77_vm1, %v73_v15, %v76_v19 }
 0x16d   :  { %v144_v22 = vpop.eup %143  ;;  %v81_v23 = vsel %vm79_vm2, %v80_v20, %v78_v21 }
 0x16e   :  { %v89_v24 = vadd.f32 1e-06, %v81_v23  ;;  %v83_v25 = vmul.f32 %v144_v22, %v74_v17 }
 0x170   :  { %145 = vrcp.f32 %v89_v24  ;;  %v85_v27 = vsel %vm84_vm3, %v74_v17, %v83_v25 }
 0x171   :  { %v88_v28 = vsel %vm86_vm4, %v87_v26, %v85_v27 }
 0x172   :  { %v90_v29 = vadd.f32 1e-06, %v88_v28 }
 0x174   :  { %147 = vrcp.f32 %v90_v29 }
 0x17a   :  { %v146_v30 = vpop.eup %145 }
 0x17b   :  { %v94_v32 = vmul.f32 %v146_v30, %v63_v6 }
 0x17d   :  { %v102_v34 = vmul.f32 %v133_v31, %v94_v32 }
 0x17e   :  { %v148_v35 = vpop.eup %147 }
 0x17f   :  { %v95_v36 = vmul.f32 %v148_v35, %v64_v10  ;;  %v111_v37 = vadd.f32 %v134_v33, %v102_v34 }
 0x181   :  { %v103_v38 = vmul.f32 %v133_v31, %v95_v36  ;;  %113 = vst.msk [vmem:[#allocation8] sm:$0xff] %vm54_vm0, %v111_v37 }
 0x183   :  { %v112_v39 = vadd.f32 %v134_v33, %v103_v38 }
 0x185   :  { %114 = vst.msk [vmem:[#allocation8 + $0x8] sm:$0xff] %vm54_vm0, %v112_v39 }
 0x186   :  { %226 = shalt.err (!%p223_p0)
}
 0x187   :  { %s227_s27 = scalar_lea.hbm %s339_s3, 256 }
 0x188   :  { %p228_p1 = scmp.ne.s32.totalorder %s339_s3, %s227_s27  ;;  %p231_p2 = scmp.lt.u32.totalorder %s227_s27, %s339_s3 }
 0x18a   :  { %p233_p3 = pnand %p231_p2, %p228_p1 }
 0x18c   :  { %236 = shalt.err (!%p233_p3)
}
 0x18d   :  { %126 = dma.vmem_to_hbm [thread:$0]  %s121_s23, 256, %s339_s3, [#allocation4], %s245_s1, %s245_s1, %s246_s8  }
 0x18e   :  { %241 = dma.done.wait [#allocation4], 256  }
 0x18f   :  { %242 = vsyncadd [#allocation4], 4294967040 }
 0x190   :  { %130 = vsyncpa [#allocation3], 1 }
 0x191   :  { %131 = vsyncpa [#allocation6], 1 }
 0x192   :  { %132 = vsyncpa [#allocation4], 1 }

</bundles_post_ra>
